<compile_context>
chip_gen: v6e
topology: v6e:2x2x1
jax: 0.10.0
libtpu: 0.0.40
codegen_flags: <defaults>
</compile_context>

<pallas_src>
import functools

import jax
import jax.numpy as jnp
from jax.experimental import pallas as pl
from jax.experimental.pallas import tpu as pltpu


def _round_up(n, m):
    return ((int(n) + m - 1) // m) * m


def _largest_divisor_leq(n, cap):
    cap = int(max(1, min(n, cap)))
    for d in range(cap, 0, -1):
        if n % d == 0:
            return d
    return 1


def _pick_block_t(t, cap_rows, t_mult):
    """Return (block_t, t_pad) with block_t % t_mult == 0, t_pad % block_t == 0,
    t_pad >= t and block_t <= max(t_mult, cap_rows): a near-balanced split, never a
    sublane-misaligned tile and never the full (possibly huge/prime) extent."""
    cap = max(t_mult, (int(cap_rows) // t_mult) * t_mult)
    t_aligned = _round_up(t, t_mult)
    if t_aligned <= cap:
        return t_aligned, t_aligned
    n_blocks = -(-t_aligned // cap)                       # ceil
    block_t = _round_up(-(-t_aligned // n_blocks), t_mult)
    return block_t, block_t * n_blocks


def _vmem_budget():
    """(per-step tile budget, scoped vmem limit), sized to the chip generation."""
    try:
        cap = int(getattr(pltpu.get_tpu_info(), "vmem_capacity_bytes",
                          64 * 1024 * 1024))
    except Exception:                       # conservative (v7x-sized) default
        cap = 64 * 1024 * 1024
    if cap >= 100 * 1024 * 1024:            # v5e / v6e: 128 MiB physical VMEM
        return 48 * 1024 * 1024, 100 * 1024 * 1024
    return 24 * 1024 * 1024, 48 * 1024 * 1024             # v7x: 64 MiB physical VMEM


def _fithubt_kernel(x_ref, w_ref, b_ref, o_ref, *, precision):
    # x_ref : (Bblk, Tblk, Hs)       one (batch-block, layer, time-block) tile of x
    # w_ref : (Hs, 2*Htp)            folded weights concat(Wtc0 @ Wfc^T, Wtc1 @ Wfc^T)
    # b_ref : (1, 2*Htp)             folded bias (f32), duplicated for both taps
    # o_ref : (Bblk, Tblk, 2*Htp)    even|odd frames packed along the lane dim
    bblk, tblk, hs_dim = x_ref.shape
    ht2 = o_ref.shape[-1]

    # Tblk is always a sublane multiple -> merging (Bblk, Tblk) into the MXU M dim
    # is a layout-preserving (free) reshape.
    xv = x_ref[...].reshape(bblk * tblk, hs_dim)

    # Single MXU matmul per tile: both conv taps (already fused with the Linear)
    # share the same LHS and are concatenated along the output lanes.
    z = jnp.dot(xv, w_ref[...], preferred_element_type=jnp.float32,
                precision=precision)
    z = z + b_ref[...]                                    # f32 accumulate + bias

    o_ref[...] = z.reshape(bblk, tblk, ht2).astype(o_ref.dtype)


@functools.partial(
    jax.jit,
    static_argnames=("num_frames", "compute_dtype", "out_dtype", "precision",
                     "block_b", "block_t"))
def fithubt_head_pallas(x, wtc, btc, wfc, bfc, *, num_frames,
                        compute_dtype=jnp.bfloat16, out_dtype=None,
                        precision=None, block_b=None, block_t=None):
    """FitHubtHead forward.

    x   : (B, L, T, Hs)     student hidden states (layer 0 skipped, as in PyTorch)
    wtc : (NL, Hs, Hs, 2)   ConvTranspose1d weights (in_ch, out_ch, kernel), NL = L-1
    btc : (NL, Hs)          ConvTranspose1d bias
    wfc : (NL, Ht, Hs)      Linear weight (PyTorch layout)
    bfc : (NL, Ht)          Linear bias
    returns (B, NL, num_frames, Ht) in `out_dtype` (defaults to compute_dtype).
    """
    B, L, T, Hs = x.shape
    NL = L - 1
    Ht = wfc.shape[1]
    assert NL >= 1
    assert wtc.shape == (NL, Hs, Hs, 2) and btc.shape == (NL, Hs)
    assert wfc.shape == (NL, Ht, Hs) and bfc.shape == (NL, Ht)
    # ConvTranspose1d(k=2, s=2) valid output lengths: 2T (output_padding=0) or 2T+1.
    assert num_frames in (2 * T, 2 * T + 1), "num_frames must be 2*T or 2*T + 1"

    compute_dtype = jnp.dtype(compute_dtype)
    out_dtype = compute_dtype if out_dtype is None else jnp.dtype(out_dtype)

    # ---- Fold the Linear into the transposed-conv taps (exact algebra; f32/HIGHEST
    # so the one-time fold does not lose precision).
    hp = jax.lax.Precision.HIGHEST
    f32 = jnp.float32
    wfc_t = jnp.transpose(wfc, (0, 2, 1)).astype(f32)                    # (NL, Hs, Ht)
    weff0 = jnp.matmul(wtc[..., 0].astype(f32), wfc_t, precision=hp)     # (NL, Hs, Ht)
    weff1 = jnp.matmul(wtc[..., 1].astype(f32), wfc_t, precision=hp)     # (NL, Hs, Ht)
    beff = jnp.einsum("lj,ljh->lh", btc.astype(f32), wfc_t, precision=hp) \
        + bfc.astype(f32)                                                # (NL, Ht)

    # Lane-dense output: pad Ht so the packed output width 2*Htp is a 128-multiple
    # (avoids masked vst.msk partial stores); pad stripped after the call.
    Ht_pad = _round_up(2 * Ht, 128) // 2
    if Ht_pad != Ht:
        weff0 = jnp.pad(weff0, ((0, 0), (0, 0), (0, Ht_pad - Ht)))
        weff1 = jnp.pad(weff1, ((0, 0), (0, 0), (0, Ht_pad - Ht)))
        beff_p = jnp.pad(beff, ((0, 0), (0, Ht_pad - Ht)))
    else:
        beff_p = beff
    # Folded weights travel in the compute dtype (bf16 by default — with DEFAULT
    # precision the MXU does a single bf16 pass anyway, so f32 weights only add HBM
    # traffic; keep w_cat in f32 + precision=HIGHEST if tighter numerics are needed).
    w_cat = jnp.concatenate([weff0, weff1], axis=-1).astype(compute_dtype)  # (NL,Hs,2Htp)
    b_cat = jnp.concatenate([beff_p, beff_p], axis=-1)[:, None, :].astype(f32)

    # ---- Block sizing: double-buffered x/out/weight tiles PLUS the f32 accumulator
    # the kernel materializes must fit the per-generation VMEM budget.
    budget, vmem_limit = _vmem_budget()
    cd_size = compute_dtype.itemsize
    od_size = out_dtype.itemsize
    w_bytes = 2 * (Hs * 2 * Ht_pad * cd_size + 2 * Ht_pad * 4)   # weights+bias, x2 bufs
    row_bytes = (2 * Hs * cd_size               # x tile rows, double buffered
                 + 2 * 2 * Ht_pad * od_size     # out tile rows, double buffered
                 + 2 * Ht_pad * 4)              # f32 matmul accumulator / bias add
    t_mult = 16 if cd_size < 4 else 8           # sublane tile (packed for bf16)
    max_rows = max(t_mult, (budget - w_bytes) // row_bytes)

    if block_t is None:
        block_t, T_pad = _pick_block_t(T, max_rows, t_mult)
    else:
        T_pad = _round_up(T, block_t)
    if block_b is None:
        block_b = _largest_divisor_leq(B, max(1, max_rows // block_t))
    assert B % block_b == 0 and T_pad % block_t == 0

    # ---- Cast / pad x once (fused by XLA); layer 0 is skipped via the index map,
    # so no HBM slice of x is materialized.
    x_in = x.astype(compute_dtype)
    if T_pad != T:
        x_in = jnp.pad(x_in, ((0, 0), (0, 0), (0, T_pad - T), (0, 0)))

    n_bblk = B // block_b
    n_tblk = T_pad // block_t

    # Grid ordering: time innermost so the folded weights stay VMEM-resident across
    # the T sweep; the outer axis (layer vs batch-block) is the one with the best
    # 2-way balance for v7x's two TensorCores (even extent preferred), layer first on
    # ties to minimise weight re-fetches.
    if NL % 2 == 0 or n_bblk < 2 or (n_bblk % 2 != 0 and NL >= n_bblk):
        grid = (NL, n_bblk, n_tblk)
        x_map = lambda l, b, t: (b, l + 1, t, 0)
        w_map = lambda l, b, t: (l, 0, 0)
        o_map = lambda l, b, t: (b, l, t, 0)
    else:
        grid = (n_bblk, NL, n_tblk)
        x_map = lambda b, l, t: (b, l + 1, t, 0)
        w_map = lambda b, l, t: (l, 0, 0)
        o_map = lambda b, l, t: (b, l, t, 0)

    grid_spec = pltpu.PrefetchScalarGridSpec(
        num_scalar_prefetch=0,
        grid=grid,
        in_specs=[
            pl.BlockSpec((block_b, pl.Squeezed(), block_t, Hs), x_map),
            pl.BlockSpec((pl.Squeezed(), Hs, 2 * Ht_pad), w_map),
            pl.BlockSpec((pl.Squeezed(), 1, 2 * Ht_pad), w_map),
        ],
        out_specs=pl.BlockSpec((block_b, pl.Squeezed(), block_t, 2 * Ht_pad), o_map),
    )

    flops = 2 * B * NL * T_pad * Hs * (2 * Ht_pad)
    bytes_accessed = (B * NL * T_pad * Hs * cd_size
                      + NL * (Hs * 2 * Ht_pad * cd_size + 2 * Ht_pad * 4)
                      + B * NL * T_pad * 2 * Ht_pad * od_size)

    out = pl.pallas_call(
        functools.partial(_fithubt_kernel, precision=precision),
        out_shape=jax.ShapeDtypeStruct((B, NL, T_pad, 2 * Ht_pad), out_dtype),
        grid_spec=grid_spec,
        compiler_params=pltpu.CompilerParams(
            dimension_semantics=("parallel", "parallel", "parallel"),
            vmem_limit_bytes=vmem_limit,
        ),
        cost_estimate=pl.CostEstimate(flops=int(flops), transcendentals=0,
                                      bytes_accessed=int(bytes_accessed)),
    )(x_in, w_cat, b_cat)

    # (B, NL, T_pad, 2*Htp) and (B, NL, 2*T_pad, Htp) are the same contiguous buffer
    # (element (b,l,t,k*Htp+h) == frame 2t+k, channel h): free reshape, no HBM pass.
    hs = out.reshape(B, NL, 2 * T_pad, Ht_pad)
    if T_pad != T or Ht_pad != Ht:
        hs = hs[:, :, : 2 * T, :Ht]          # strip T / Ht padding (single fused slice)
    if num_frames == 2 * T + 1:
        # ConvTranspose1d output_padding = 1: the extra trailing frame receives no
        # input taps, only the (folded) bias.
        pad = jnp.broadcast_to(beff[None, :, None, :].astype(hs.dtype), (B, NL, 1, Ht))
        hs = jnp.concatenate([hs, pad], axis=2)
    return hs


def fithubt_head_ref(x, wtc, btc, wfc, bfc, num_frames):
    """Pure-JAX reference mirroring the PyTorch module (f32, highest precision)."""
    B, L, T, Hs = x.shape
    hp = jax.lax.Precision.HIGHEST
    outs = []
    for i in range(1, L):
        xi = x[:, i].astype(jnp.float32)                                  # (B, T, Hs)
        y0 = jnp.einsum("btj,jo->bto", xi, wtc[i - 1, :, :, 0].astype(jnp.float32),
                        precision=hp) + btc[i - 1]
        y1 = jnp.einsum("btj,jo->bto", xi, wtc[i - 1, :, :, 1].astype(jnp.float32),
                        precision=hp) + btc[i - 1]
        y = jnp.stack([y0, y1], axis=2).reshape(B, 2 * T, Hs)             # interleave
        if num_frames == 2 * T + 1:                                       # output_padding
            y = jnp.concatenate(
                [y, jnp.broadcast_to(btc[i - 1][None, None, :], (B, 1, Hs))], axis=1)
        z = jnp.einsum("bto,ho->bth", y, wfc[i - 1].astype(jnp.float32),
                       precision=hp) + bfc[i - 1]
        outs.append(z)
    return jnp.stack(outs, axis=1)


if __name__ == "__main__":
    # Small shapes consistent with the module's forward.
    B = 2              # batch
    NUM_LAYER = 3      # len(tconv) == len(fc)
    L = NUM_LAYER + 1  # x has a `layer` dim; layers 1..L-1 are processed
    T = 8              # student frame count before 2x upsampling
    HS = 32            # hidden_size_s
    HT = 48            # hidden_size_t
    NUM_FRAMES = 2 * T

    key = jax.random.PRNGKey(0)
    kx, kw, kb, kf, kg = jax.random.split(key, 5)

    x = jax.random.normal(kx, (B, L, T, HS), dtype=jnp.float32)
    wtc = 0.1 * jax.random.normal(kw, (NUM_LAYER, HS, HS, 2), dtype=jnp.float32)
    btc = 0.1 * jax.random.normal(kb, (NUM_LAYER, HS), dtype=jnp.float32)
    wfc = 0.1 * jax.random.normal(kf, (NUM_LAYER, HT, HS), dtype=jnp.float32)
    bfc = 0.1 * jax.random.normal(kg, (NUM_LAYER, HT), dtype=jnp.float32)

    ref = fithubt_head_ref(x, wtc, btc, wfc, bfc, NUM_FRAMES)

    # f32 compute / f32 output (closest to the PyTorch module; MXU still runs DEFAULT
    # precision, hence the 2e-2 tolerance from the fused-weight fold).
    hs_f32 = jax.block_until_ready(
        fithubt_head_pallas(x, wtc, btc, wfc, bfc, num_frames=NUM_FRAMES,
                            compute_dtype=jnp.float32, out_dtype=jnp.float32))
    assert hs_f32.shape == (B, NUM_LAYER, NUM_FRAMES, HT), hs_f32.shape
    assert jnp.allclose(hs_f32, ref, atol=2e-2, rtol=2e-2), \
        float(jnp.max(jnp.abs(hs_f32 - ref)))

    # Default path: bf16 compute/IO (recommended at real HuBERT sizes — the kernel is
    # HBM-bound on v6e/v7x, so halving input+output bytes is the dominant lever).
    hs_bf16 = jax.block_until_ready(
        fithubt_head_pallas(x, wtc, btc, wfc, bfc, num_frames=NUM_FRAMES))
    assert hs_bf16.shape == (B, NUM_LAYER, NUM_FRAMES, HT), hs_bf16.shape
    assert hs_bf16.dtype == jnp.bfloat16
    assert jnp.allclose(hs_bf16.astype(jnp.float32), ref, atol=6e-2, rtol=6e-2), \
        float(jnp.max(jnp.abs(hs_bf16.astype(jnp.float32) - ref)))

    # output_padding path: num_frames == 2*T + 1.
    ref_pad = fithubt_head_ref(x, wtc, btc, wfc, bfc, NUM_FRAMES + 1)
    hs_pad = jax.block_until_ready(
        fithubt_head_pallas(x, wtc, btc, wfc, bfc, num_frames=NUM_FRAMES + 1,
                            compute_dtype=jnp.float32, out_dtype=jnp.float32))
    assert hs_pad.shape == (B, NUM_LAYER, NUM_FRAMES + 1, HT), hs_pad.shape
    assert jnp.allclose(hs_pad, ref_pad, atol=2e-2, rtol=2e-2)

    print("KERNEL_OK")
</pallas_src>

<mosaic_0001>
module attributes {stable_mosaic.version = 11 : i64} {
  func.func @_fithubt_kernel(%arg0: i32, %arg1: i32, %arg2: i32, %arg3: memref<2x1x8x32xf32, #tpu.memory_space<vmem>>, %arg4: memref<1x32x128xf32, #tpu.memory_space<vmem>>, %arg5: memref<1x1x128xf32, #tpu.memory_space<vmem>>, %arg6: memref<2x1x8x128xf32, #tpu.memory_space<vmem>>) attributes {dimension_semantics = [#tpu.dimension_semantics<parallel>, #tpu.dimension_semantics<parallel>, #tpu.dimension_semantics<parallel>], iteration_bounds = array<i64: 3, 1, 1>, scalar_prefetch = 0 : i64, scratch_operands = 0 : i64, tpu.core_type = #tpu.core_type<tc>, window_params = [{transform_indices = @transform_0, window_bounds = array<i64: 2, 1, 8, 32>}, {transform_indices = @transform_1, window_bounds = array<i64: 1, 32, 128>}, {transform_indices = @transform_2, window_bounds = array<i64: 1, 1, 128>}, {transform_indices = @transform_3, window_bounds = array<i64: 2, 1, 8, 128>}]} {
    %c0 = arith.constant 0 : index
    %c0_0 = arith.constant 0 : index
    %c0_1 = arith.constant 0 : index
    %c0_2 = arith.constant 0 : index
    %0 = vector.load %arg3[%c0, %c0_0, %c0_1, %c0_2] : memref<2x1x8x32xf32, #tpu.memory_space<vmem>>, vector<2x1x8x32xf32>
    %1 = vector.shape_cast %0 : vector<2x1x8x32xf32> to vector<2x8x32xf32>
    %2 = vector.shape_cast %1 : vector<2x8x32xf32> to vector<16x32xf32>
    %c0_3 = arith.constant 0 : index
    %c0_4 = arith.constant 0 : index
    %c0_5 = arith.constant 0 : index
    %3 = vector.load %arg4[%c0_3, %c0_4, %c0_5] : memref<1x32x128xf32, #tpu.memory_space<vmem>>, vector<1x32x128xf32>
    %4 = vector.shape_cast %3 : vector<1x32x128xf32> to vector<32x128xf32>
    %cst = arith.constant dense<0.000000e+00> : vector<16x128xf32>
    %5 = tpu.matmul %2, %4, %cst {dimension_numbers = #tpu.dot_dimension_numbers<[1], [0], [0], [1], [0, 0, 1, 1], [], []>} : vector<16x32xf32>, vector<32x128xf32>, vector<16x128xf32> -> vector<16x128xf32>
    %c0_6 = arith.constant 0 : index
    %c0_7 = arith.constant 0 : index
    %c0_8 = arith.constant 0 : index
    %6 = vector.load %arg5[%c0_6, %c0_7, %c0_8] : memref<1x1x128xf32, #tpu.memory_space<vmem>>, vector<1x1x128xf32>
    %7 = vector.shape_cast %6 : vector<1x1x128xf32> to vector<1x128xf32>
    %8 = vector.broadcast %7 : vector<1x128xf32> to vector<16x128xf32>
    %9 = arith.addf %5, %8 : vector<16x128xf32>
    %10 = vector.shape_cast %9 : vector<16x128xf32> to vector<2x8x128xf32>
    %c0_9 = arith.constant 0 : index
    %c0_10 = arith.constant 0 : index
    %c0_11 = arith.constant 0 : index
    %c0_12 = arith.constant 0 : index
    %11 = vector.load %arg6[%c0_9, %c0_10, %c0_11, %c0_12] : memref<2x1x8x128xf32, #tpu.memory_space<vmem>>, vector<2x1x8x128xf32>
    %12 = vector.shape_cast %11 : vector<2x1x8x128xf32> to vector<2x8x128xf32>
    %13 = vector.shape_cast %10 : vector<2x8x128xf32> to vector<2x1x8x128xf32>
    tpu.vector_store %arg6[%c0_9, %c0_10, %c0_11, %c0_12], %13 {strides = array<i32>} : memref<2x1x8x128xf32, #tpu.memory_space<vmem>>, vector<2x1x8x128xf32>,
    return
  }
  func.func @transform_0(%arg0: i32, %arg1: i32, %arg2: i32) -> (i32, i32, i32, i32) {
    %c1_i32 = arith.constant 1 : i32
    %0 = arith.addi %arg0, %c1_i32 : i32
    %c0_i32 = arith.constant 0 : i32
    %c0_i32_0 = arith.constant 0 : i32
    return %arg1, %0, %arg2, %c0_i32 : i32, i32, i32, i32
  }
  func.func @transform_1(%arg0: i32, %arg1: i32, %arg2: i32) -> (i32, i32, i32) {
    %c0_i32 = arith.constant 0 : i32
    %c0_i32_0 = arith.constant 0 : i32
    %c0_i32_1 = arith.constant 0 : i32
    return %arg0, %c0_i32, %c0_i32_0 : i32, i32, i32
  }
  func.func @transform_2(%arg0: i32, %arg1: i32, %arg2: i32) -> (i32, i32, i32) {
    %c0_i32 = arith.constant 0 : i32
    %c0_i32_0 = arith.constant 0 : i32
    %c0_i32_1 = arith.constant 0 : i32
    return %arg0, %c0_i32, %c0_i32_0 : i32, i32, i32
  }
  func.func @transform_3(%arg0: i32, %arg1: i32, %arg2: i32) -> (i32, i32, i32, i32) {
    %c0_i32 = arith.constant 0 : i32
    %c0_i32_0 = arith.constant 0 : i32
    return %arg1, %arg0, %arg2, %c0_i32 : i32, i32, i32, i32
  }
}

</mosaic_0001>

<bundles_post_ra>
// kernel: fithubt_head_pallas.1
= control target key start
LH: loop header
LB: loop body
LE: loop exit
PB: predicated region body
PF: predicated region fallthrough
CT: control target
= control target key end

     0   :  { %s688_s12 = smov 0   ;;  %s690_s13 = smov 0   ;;  %s800_s0 = inlined_call_operand.vmem [shape: f32[2,4,8,32], index: 0, kind: input, shape index: {}]   ;;  %s801_s1 = inlined_call_operand.vmem [shape: f32[3,32,128], index: 1, kind: input, shape index: {}]   ;;  %s802_s2 = inlined_call_operand.vmem [shape: f32[3,1,128], index: 2, kind: input, shape index: {}]   ;;  %s803_s3 = inlined_call_operand.vmem [shape: f32[2,3,8,128], index: 3, kind: output, shape index: {}]  }
   0x1   :  { %s692_s14 = smov 0   ;;  %s694_s15 = smov 0  }
   0x2   :  { %s696_s16 = smov 0   ;;  %s698_s17 = smov 0  }
   0x3   :  { %s700_s18 = smov 0  }
   0x4 LB: > { %s518_s19 = sadd.s32 4294967295, %s666_s18   ;;  %s32_s20 = sadd.s32 1, %s662_s17  ;;  %s666_s18 = sphi %s700_s18, %s13_s18   ;;  %s662_s17 = sphi %s698_s17, %s811_s17   ;;  %s658_s16 = sphi %s696_s16, %s810_s16   ;;  %s654_s15 = sphi %s694_s15, %s809_s15   ;;  %s650_s14 = sphi %s692_s14, %s808_s14   ;;  %s646_s13 = sphi %s690_s13, %s807_s13   ;;  %s642_s12 = sphi %s688_s12, %s806_s12  }
   0x5   : > { %p34_p0 = scmp.ge.s32.totalorder %s32_s20, 3  ;;  %s45_s21 = sadd.s32 1, %s654_s15 }
   0x6   : > { %p52_p1 = scmp.ne.s32.totalorder %s654_s15, %s650_s14  ;;  %p53_p2 = scmp.eq.s32.totalorder %s666_s18, 0 }
   0x7   : > { %s729_s22 = scalar_select %p34_p0, 0, %s32_s20  }
   0x8   : > { %p731_p3 = por %p53_p2, %p52_p1  ;;  %s127_s24 = sadd.s32 1, %s646_s13 }
   0x9   : > { %s37_s25 = sadd.s32 1, %s729_s22  ;;  %s121_s26 = ssub.s32 %s662_s17, %s729_s22 }
   0xa   : > { %s39_s27 = ssub.s32 %s32_s20, %s37_s25  ;;  %p125_p4 = scmp.eq.s32.totalorder %s121_s26, 0 }
   0xb   : > { %p43_p5 = scmp.eq.s32.totalorder %s39_s27, 0  ;;  %p137_p6 = scmp.ne.s32.totalorder %s646_s13, %s642_s12 }
   0xc   : > { %s742_s28 = scalar_select %p125_p4, %s646_s13, %s127_s24  }
   0xd   : > { %s745_s29 = scalar_select %p43_p5, %s654_s15, %s45_s21  }
   0xe   : > { %p138_p7 = scmp.eq.s32.totalorder %s518_s19, 2  ;;  %p521_p9 = scmp.ge.s32.totalorder %s666_s18, 3 }
  0x10   : > { %p747_p8 = por %p138_p7, %p137_p6  ;;  %160 = sbr.rel (%p521_p9) target bundleno = 27 (0x1b), region = 16 }
  0x15   : > { %163 = sbr.rel (!%p731_p3) target bundleno = 27 (0x1b), region = 20  ;;  %s165_s4 = sand.u32 (%p731_p3), 1, %s654_s15  }
  0x16   : > { %s523_s5 = sshll.u32 (%p731_p3), %s662_s17, 3  ;;  %s522_s6 = sshll.u32 (%p731_p3), %s165_s4, 4 }
  0x17   : > { %s440_s9 = scalar_lea.vmem (%p731_p3), %s800_s0, %s523_s5  ;;  %s167_s10 = scalar_lea.vmem (%p731_p3), [#allocation2], %s522_s6 }
  0x18   : > { %v524_v0 = vld [vmem:[%s440_s9 + $0x8] sm:$0xff] (%p731_p3) }
  0x19   : > { %v525_v1 = vld [vmem:[%s440_s9 + $0x28] sm:$0xff] (%p731_p3)  ;;  %206 = vst [vmem:[%s167_s10] sm:$0xff] (%p731_p3), %v524_v0 }
  0x1a   : > { %208 = vst [vmem:[%s167_s10 + $0x8] sm:$0xff] %v525_v1 }
  0x1b PF: > { %p526_p10 = scmp.ge.s32.totalorder %s666_s18, 1  ;;  %p227_p11 = scmp.lt.s32.totalorder %s666_s18, 4 }
  0x1d   : > { %p228_p12 = pnand %p526_p10, %p227_p11 }
  0x1e   : > { %p266_p13 = scmp.lt.s32.totalorder (!%p228_p12), %s658_s16, 2  ;;  %s234_s11 = sand.u32 (!%p228_p12), 1, %s650_s14  }
  0x1f   : > { %231 = sbr.rel (%p228_p12) target bundleno = 255 (0xff), region = 66  ;;  %s527_s19 = sshll.u32 (!%p228_p12), %s234_s11, 4 }
  0x20   : > { %s236_s23 = scalar_lea.vmem (!%p228_p12), [#allocation2], %s527_s19  ;;  %s261_s14 = sand.u32 (!%p228_p12), 1, %s642_s12  }
  0x21   : > { %s528_s6 = sshll.u32 (!%p228_p12), %s261_s14, 4 }
  0x22   : > { %s263_s7 = scalar_lea.vmem (!%p228_p12), [#allocation3], %s528_s6 }
  0x24   : > { %s267_s20 = scalar_select %p266_p13, %s658_s16, 2  ;;  %vm288_vm0 = vcmask 261120   ;;  %v275_v2 = vld [vmem:[%s236_s23] sm:$0xff]  ;;  %v276_v7 = vld [vmem:[%s236_s23 + $0x8] sm:$0xff] }
  0x25   : > { %553 = vmatprep.mubr.msk.f32.mxu0 %vm288_vm0, %v275_v2  ;;  %s535_s8 = sshll.u32 (%p747_p8), %s658_s16, 3 }
  0x26   : > { %s538_s21 = sshll.u32 %s267_s20, 5  ;;  %s273_s5 = scalar_lea.vmem %s802_s2, %s267_s20 }
  0x27   : > { %s270_s26 = scalar_lea.vmem %s801_s1, %s538_s21  ;;  %v531_v8 = vld [vmem:[%s273_s5] ss:$0 sm:$0xff]  ;;  %s384_s10 = scalar_lea.vmem (%p747_p8), %s803_s3, %s535_s8 }
  0x28   : > { %v280_v3 = vld [vmem:[%s270_s26 + $0x18] sm:$0xff]  ;;  %v279_v4 = vld [vmem:[%s270_s26 + $0x10] sm:$0xff]  ;;  %v278_v5 = vld [vmem:[%s270_s26 + $0x8] sm:$0xff] }
  0x29   : > { %545 = vmatprep.subr.mxu0 %v280_v3  ;;  %v277_v6 = vld [vmem:[%s270_s26] sm:$0xff] }
  0x2a   : > { %546 = vmatpush3.msra.mxu0 %v280_v3 }
  0x2b   : > { %547 = vmatprep.subr.mxu0 %v279_v4 }
  0x2c   : > { %548 = vmatpush3.msra.mxu0 %v279_v4 }
  0x2d   : > { %549 = vmatprep.subr.mxu0 %v278_v5 }
  0x2e   : > { %550 = vmatpush3.msra.mxu0 %v278_v5 }
  0x2f   : > { %551 = vmatprep.subr.mxu0 %v277_v6 }
  0x30   : > { %552 = vmatpush3.msra.mxu0 %v277_v6 }
  0x31   : > { %554 = vmatmul.mubr.msk.f32.vlgmr.msra.gmra.mxu0 %vm288_vm0, %v276_v7 }
  0xf1   : > { %v555_v9 = vpop.f32.mrf.mxu0 }
  0xf2   : > { %v367_v10 = vadd.f32 %v555_v9, %v531_v8  ;;  %378 = sbr.rel (!%p747_p8) target bundleno = 255 (0xff), region = 74 }
  0xf3   : > { %v361_v11 = vpop.f32.mrf.mxu0 }
  0xf4   : > { %371 = vst [vmem:[%s263_s7 + $0x8] sm:$0xff] %v367_v10  ;;  %v362_v12 = vadd.f32 %v531_v8, %v361_v11 }
  0xf6   : > { %370 = vst [vmem:[%s263_s7] sm:$0xff] %v362_v12 }
  0xfb   : > { %v417_v14 = vld [vmem:[%s263_s7 + $0x8] sm:$0xff] }
  0xfc   : > { %418 = vst [vmem:[%s384_s10 + $0x18] sm:$0xff] %v417_v14 }
  0xfd   : > { %v415_v13 = vld [vmem:[%s263_s7] sm:$0xff] }
  0xfe   : > { %416 = vst [vmem:[%s384_s10] sm:$0xff] %v415_v13 }
  0xff PF: > { %s13_s18 = sadd.s32 1, %s666_s18   ;;  %s806_s12 = smov %s646_s13 }
 0x100   : > { %p10_p0 = scmp.ge.s32.totalorder %s13_s18, 5   ;;  %s807_s13 = smov %s742_s28 }
 0x101   : > { %s808_s14 = smov %s654_s15  ;;  %s809_s15 = smov %s745_s29 }
 0x102   : > { %s810_s16 = smov %s662_s17  ;;  %s811_s17 = smov %s729_s22 }
 0x103   :  { %12 = sbr.rel (!%p10_p0) target bundleno = 4 (0x4), region = 149 }

</bundles_post_ra>
